<compile_context>
chip_gen: v6e
topology: v6e:2x2x1
jax: 0.10.0
libtpu: 0.0.40
codegen_flags: <defaults>
</compile_context>

<pallas_src>
import jax
import jax.numpy as jnp
from jax.experimental import pallas as pl
from jax.experimental.pallas import tpu as pltpu


def _round_up(x, m):
    return (x + m - 1) // m * m


def _vmem_limit_bytes():
    """Per-generation scoped VMEM limit: ~3/4 of physical, capped at 96 MiB."""
    phys = 64 * 1024 * 1024  # conservative default (v7x per-TC VMEM)
    try:
        info = pltpu.get_tpu_info()
        phys = int(getattr(info, "vmem_capacity_bytes", phys))
    except Exception:
        pass
    return min(phys * 3 // 4, 96 * 1024 * 1024)


def _select_decoder_tiles(M, V, H, out_itemsize, in_itemsize, budget_bytes):
    """Pick (tm, tn) for the decoder matmul, largest tm first (fewest emb re-streams)."""
    tm_cap = _round_up(min(M, 2048), 8)
    if M >= 1024:
        # keep grid_m >= 2 so the "parallel" row axis can feed both TCs (v7x megacore)
        tm_cap = min(tm_cap, max(_round_up(-(-M // 2), 8), 8))
    tn_cap = _round_up(min(V, 1024), 128)
    tm_cands = sorted({min(t, tm_cap) for t in (2048, 1024, 512, 256, 128, 64, 32, 16, 8)},
                      reverse=True)
    tn_cands = sorted({min(t, tn_cap) for t in (1024, 512, 256, 128)}, reverse=True)
    for tm in tm_cands:
        for tn in tn_cands:
            # double-buffered pipeline buffers: activations, emb tile, bias tile, output tile
            need = (2 * tm * H * in_itemsize
                    + 2 * H * tn * in_itemsize
                    + 2 * tn * 4
                    + 2 * tm * tn * out_itemsize)
            if need <= budget_bytes:
                return tm, tn
    return tm_cands[-1], tn_cands[-1]


# ----------------------------------------------------------------------------
# Kernel 1: prediction-head transform  t = LayerNorm(ReLU(x @ Wd + bd))
# ----------------------------------------------------------------------------
def _transform_kernel(x_ref, wt_ref, b_ref, g_ref, be_ref, t_ref):
    # x_ref: (tmt, H) bf16; wt_ref: (H, H) bf16 (in, out); b/g/be: (1, H) f32
    h = jnp.dot(x_ref[...], wt_ref[...], preferred_element_type=jnp.float32)
    h = h + b_ref[...]
    h = jnp.maximum(h, 0.0)                                   # ReLU
    mean = jnp.mean(h, axis=-1, keepdims=True)                # LayerNorm, eps=1e-12, f32
    c = h - mean
    var = jnp.mean(c * c, axis=-1, keepdims=True)
    t = c * jax.lax.rsqrt(var + 1e-12) * g_ref[...] + be_ref[...]
    t_ref[...] = t.astype(t_ref.dtype)


# ----------------------------------------------------------------------------
# Kernel 2: decoder  scores = t @ E^T + b_dec
# ----------------------------------------------------------------------------
def _decoder_kernel(t_ref, embt_ref, dbias_ref, out_ref):
    # t_ref: (tm, H) bf16; embt_ref: (H, tn) bf16; dbias_ref: (1, tn) f32
    s = jnp.dot(t_ref[...], embt_ref[...], preferred_element_type=jnp.float32)
    out_ref[...] = (s + dbias_ref[...]).astype(out_ref.dtype)


# ----------------------------------------------------------------------------
# Kernel 3: seq_relationship head (tiny (B, H) @ (H, 2), padded to 128 lanes)
# ----------------------------------------------------------------------------
def _seq_rel_kernel(x_ref, w_ref, b_ref, o_ref):
    y = jnp.dot(x_ref[...], w_ref[...], preferred_element_type=jnp.float32)
    o_ref[...] = (y + b_ref[...]).astype(o_ref.dtype)


# ----------------------------------------------------------------------------
# One-time parameter preparation (hoisted out of the per-call hot path)
# ----------------------------------------------------------------------------
def prepare_bert_heads_params(w_dense, b_dense, ln_gamma, ln_beta,
                              emb, decoder_bias, w_seqrel, b_seqrel,
                              *, compute_dtype=jnp.bfloat16):
    """PyTorch layouts in: w_dense (H, H) [out, in]; emb (V, H); w_seqrel (2, H)."""
    H = w_dense.shape[1]
    V = emb.shape[0]
    N = w_seqrel.shape[0]
    n_pad = _round_up(N, 128)
    return dict(
        w_dense_t=jnp.asarray(w_dense).T.astype(compute_dtype),           # (H_in, H_out)
        b_dense=jnp.asarray(b_dense).reshape(1, H).astype(jnp.float32),
        ln_gamma=jnp.asarray(ln_gamma).reshape(1, H).astype(jnp.float32),
        ln_beta=jnp.asarray(ln_beta).reshape(1, H).astype(jnp.float32),
        emb_t=jnp.asarray(emb).T.astype(compute_dtype),                   # (H, V)
        decoder_bias=jnp.asarray(decoder_bias).reshape(1, V).astype(jnp.float32),
        w_seqrel_t=jnp.pad(jnp.asarray(w_seqrel).T,
                           ((0, 0), (0, n_pad - N))).astype(compute_dtype),  # (H, n_pad)
        b_seqrel=jnp.pad(jnp.asarray(b_seqrel),
                         (0, n_pad - N)).reshape(1, n_pad).astype(jnp.float32),
        n_seqrel=N,
        compute_dtype=compute_dtype,
    )


# ----------------------------------------------------------------------------
# Forward wrapper
# ----------------------------------------------------------------------------
def bert_pretraining_heads(sequence_output, pooled_output, params,
                           *, scores_dtype=None, tm=None, tn=None, tm_transform=None):
    """BertPreTrainingHeads forward.

    sequence_output: (B, S, H); pooled_output: (B, H); params from prepare_bert_heads_params.
    Returns (prediction_scores (B, S, V), seq_relationship_score (B, 2)).
    Set scores_dtype=jnp.bfloat16 to halve the (M, V) writeback stream.
    """
    B, S, H = sequence_output.shape
    compute_dtype = params["compute_dtype"]
    emb_t = params["emb_t"]
    V = emb_t.shape[1]
    out_dtype = scores_dtype if scores_dtype is not None else sequence_output.dtype

    M = B * S
    x2 = sequence_output.reshape(M, H).astype(compute_dtype)

    cdt_isz = jnp.dtype(compute_dtype).itemsize
    out_isz = jnp.dtype(out_dtype).itemsize
    vmem_limit = _vmem_limit_bytes()
    tile_budget = vmem_limit * 7 // 10
    if tm is None or tn is None:
        tm_sel, tn_sel = _select_decoder_tiles(M, V, H, out_isz, cdt_isz, tile_budget)
        tm = tm if tm is not None else tm_sel
        tn = tn if tn is not None else tn_sel

    # ---- Stage 1: transform  (M, H) -> (M, H) bf16 --------------------------------
    tmt = tm_transform if tm_transform is not None else min(512, _round_up(M, 8))
    tmt = _round_up(tmt, 8)
    grid_t = pl.cdiv(M, tmt)
    t = pl.pallas_call(
        _transform_kernel,
        out_shape=jax.ShapeDtypeStruct((M, H), compute_dtype),
        grid_spec=pltpu.PrefetchScalarGridSpec(
            num_scalar_prefetch=0,
            grid=(grid_t,),
            in_specs=[
                pl.BlockSpec((tmt, H), lambda i: (i, 0)),   # activations (row tile)
                pl.BlockSpec((H, H), lambda i: (0, 0)),     # dense weight (resident)
                pl.BlockSpec((1, H), lambda i: (0, 0)),     # dense bias
                pl.BlockSpec((1, H), lambda i: (0, 0)),     # layernorm gamma
                pl.BlockSpec((1, H), lambda i: (0, 0)),     # layernorm beta
            ],
            out_specs=pl.BlockSpec((tmt, H), lambda i: (i, 0)),
        ),
        compiler_params=pltpu.CompilerParams(
            dimension_semantics=("parallel",),
            vmem_limit_bytes=vmem_limit,
        ),
        cost_estimate=pl.CostEstimate(
            flops=2 * M * H * H,
            transcendentals=M,
            bytes_accessed=2 * M * H * cdt_isz + H * H * cdt_isz),
    )(x2, params["w_dense_t"], params["b_dense"], params["ln_gamma"], params["ln_beta"])

    # ---- Stage 2: decoder  (M, H) @ (H, V) + bias -> (M, V) -----------------------
    grid_m = pl.cdiv(M, tm)
    grid_v = pl.cdiv(V, tn)
    # emb_t is re-streamed once per row tile -> count it grid_m times in the estimate.
    dec_bytes = grid_m * H * V * cdt_isz + M * H * cdt_isz + M * V * out_isz + V * 4
    scores = pl.pallas_call(
        _decoder_kernel,
        out_shape=jax.ShapeDtypeStruct((M, V), out_dtype),
        grid_spec=pltpu.PrefetchScalarGridSpec(
            num_scalar_prefetch=0,
            grid=(grid_m, grid_v),
            in_specs=[
                # index invariant in j -> fetched only when the row tile changes
                pl.BlockSpec((tm, H), lambda i, j: (i, 0)),
                pl.BlockSpec((H, tn), lambda i, j: (0, j)),   # embedding^T (vocab tile)
                pl.BlockSpec((1, tn), lambda i, j: (0, j)),   # decoder bias (vocab tile)
            ],
            out_specs=pl.BlockSpec((tm, tn), lambda i, j: (i, j)),
        ),
        compiler_params=pltpu.CompilerParams(
            dimension_semantics=("parallel", "parallel"),
            vmem_limit_bytes=vmem_limit,
        ),
        cost_estimate=pl.CostEstimate(
            flops=2 * M * V * H,
            transcendentals=0,
            bytes_accessed=dec_bytes),
    )(t, emb_t, params["decoder_bias"])

    prediction_scores = scores.reshape(B, S, V)   # free metadata reshape, no copy

    # ---- seq_relationship head (negligible cost) ----------------------------------
    n_pad = params["w_seqrel_t"].shape[1]
    pooledc = pooled_output.astype(compute_dtype)
    sr_pad = pl.pallas_call(
        _seq_rel_kernel,
        out_shape=jax.ShapeDtypeStruct((B, n_pad), sequence_output.dtype),
        grid_spec=pltpu.PrefetchScalarGridSpec(
            num_scalar_prefetch=0,
            grid=(1,),
            in_specs=[
                pl.BlockSpec((B, H), lambda i: (0, 0)),
                pl.BlockSpec((H, n_pad), lambda i: (0, 0)),
                pl.BlockSpec((1, n_pad), lambda i: (0, 0)),
            ],
            out_specs=pl.BlockSpec((B, n_pad), lambda i: (0, 0)),
        ),
    )(pooledc, params["w_seqrel_t"], params["b_seqrel"])
    seq_relationship_score = sr_pad[:, :params["n_seqrel"]]

    return prediction_scores, seq_relationship_score


# ----------------------------------------------------------------------------
# Reference (plain JAX, identical dtype handling to the kernels)
# ----------------------------------------------------------------------------
def _reference(seq_out, pooled, w_dense, b_dense, g, be, emb, dbias, w_sr, b_sr,
               compute_dtype=jnp.bfloat16):
    B, S, H = seq_out.shape
    x = seq_out.reshape(-1, H).astype(compute_dtype)
    h = jnp.dot(x, w_dense.T.astype(compute_dtype),
                preferred_element_type=jnp.float32) + b_dense
    h = jnp.maximum(h, 0.0)
    mu = jnp.mean(h, axis=-1, keepdims=True)
    c = h - mu
    var = jnp.mean(c * c, axis=-1, keepdims=True)
    t = (c * jax.lax.rsqrt(var + 1e-12)) * g + be
    t = t.astype(compute_dtype)
    scores = jnp.dot(t, emb.T.astype(compute_dtype),
                     preferred_element_type=jnp.float32) + dbias
    scores = scores.reshape(B, S, -1).astype(seq_out.dtype)
    sr = jnp.dot(pooled.astype(compute_dtype), w_sr.T.astype(compute_dtype),
                 preferred_element_type=jnp.float32) + b_sr
    return scores, sr.astype(seq_out.dtype)


if __name__ == "__main__":
    # Small config: batch=2, seq=8, hidden=32, vocab=128.
    # TODO(synk): add a full-size (H=768, V=30522) interpret-mode test for the ragged
    # vocab / large-tile path before shipping tile-size changes.
    B, S, H, V = 2, 8, 32, 128
    key = jax.random.PRNGKey(0)
    ks = jax.random.split(key, 8)

    seq_out = jax.random.normal(ks[0], (B, S, H), dtype=jnp.float32)
    pooled = jax.random.normal(ks[1], (B, H), dtype=jnp.float32)

    # Synthetic parameters (PyTorch layouts: Linear weight is (out, in)).
    w_dense = jax.random.normal(ks[2], (H, H), dtype=jnp.float32) * 0.02
    b_dense = jax.random.normal(ks[3], (H,), dtype=jnp.float32) * 0.02
    ln_g = 1.0 + 0.1 * jax.random.normal(ks[4], (H,), dtype=jnp.float32)
    ln_b = 0.1 * jax.random.normal(ks[5], (H,), dtype=jnp.float32)
    emb = jax.random.normal(ks[6], (V, H), dtype=jnp.float32) * 0.02   # (vocab, hidden)
    dec_bias = jnp.zeros((V,), dtype=jnp.float32)                      # decoder bias init = 0
    w_sr = jax.random.normal(ks[7], (2, H), dtype=jnp.float32) * 0.02
    b_sr = jnp.zeros((2,), dtype=jnp.float32)

    # One-time parameter prep (hoisted out of the forward hot path).
    params = prepare_bert_heads_params(w_dense, b_dense, ln_g, ln_b,
                                       emb, dec_bias, w_sr, b_sr)

    pred, seqrel = bert_pretraining_heads(seq_out, pooled, params)
    pred, seqrel = jax.block_until_ready((pred, seqrel))

    ref_pred, ref_sr = _reference(seq_out, pooled, w_dense, b_dense, ln_g, ln_b,
                                  emb, dec_bias, w_sr, b_sr)

    assert pred.shape == (B, S, V)
    assert seqrel.shape == (B, 2)
    assert jnp.allclose(pred, ref_pred, atol=2e-3, rtol=2e-3)
    assert jnp.allclose(seqrel, ref_sr, atol=2e-3, rtol=2e-3)

    print("KERNEL_OK")
</pallas_src>

<mosaic_0001>
module attributes {stable_mosaic.version = 11 : i64} {
  func.func @_transform_kernel(%arg0: i32, %arg1: memref<16x32xbf16, #tpu.memory_space<vmem>>, %arg2: memref<32x32xbf16, #tpu.memory_space<vmem>>, %arg3: memref<1x32xf32, #tpu.memory_space<vmem>>, %arg4: memref<1x32xf32, #tpu.memory_space<vmem>>, %arg5: memref<1x32xf32, #tpu.memory_space<vmem>>, %arg6: memref<16x32xbf16, #tpu.memory_space<vmem>>) attributes {dimension_semantics = [#tpu.dimension_semantics<parallel>], iteration_bounds = array<i64: 1>, scalar_prefetch = 0 : i64, scratch_operands = 0 : i64, tpu.core_type = #tpu.core_type<tc>, window_params = [{transform_indices = @transform_0, window_bounds = array<i64: 16, 32>}, {pipeline_mode = #tpu.pipeline_mode<synchronous>, transform_indices = @transform_1, window_bounds = array<i64: 32, 32>}, {pipeline_mode = #tpu.pipeline_mode<synchronous>, transform_indices = @transform_2, window_bounds = array<i64: 1, 32>}, {pipeline_mode = #tpu.pipeline_mode<synchronous>, transform_indices = @transform_3, window_bounds = array<i64: 1, 32>}, {pipeline_mode = #tpu.pipeline_mode<synchronous>, transform_indices = @transform_4, window_bounds = array<i64: 1, 32>}, {transform_indices = @transform_5, window_bounds = array<i64: 16, 32>}]} {
    %c0 = arith.constant 0 : index
    %c0_0 = arith.constant 0 : index
    %0 = vector.load %arg1[%c0, %c0_0] : memref<16x32xbf16, #tpu.memory_space<vmem>>, vector<16x32xbf16>
    %c0_1 = arith.constant 0 : index
    %c0_2 = arith.constant 0 : index
    %1 = vector.load %arg2[%c0_1, %c0_2] : memref<32x32xbf16, #tpu.memory_space<vmem>>, vector<32x32xbf16>
    %cst = arith.constant dense<0.000000e+00> : vector<16x32xf32>
    %2 = tpu.matmul %0, %1, %cst {dimension_numbers = #tpu.dot_dimension_numbers<[1], [0], [0], [1], [0, 0, 1, 1], [], []>} : vector<16x32xbf16>, vector<32x32xbf16>, vector<16x32xf32> -> vector<16x32xf32>
    %c0_3 = arith.constant 0 : index
    %c0_4 = arith.constant 0 : index
    %3 = vector.load %arg3[%c0_3, %c0_4] : memref<1x32xf32, #tpu.memory_space<vmem>>, vector<1x32xf32>
    %4 = vector.broadcast %3 : vector<1x32xf32> to vector<16x32xf32>
    %5 = arith.addf %2, %4 : vector<16x32xf32>
    %cst_5 = arith.constant 0.000000e+00 : f32
    %6 = vector.broadcast %cst_5 : f32 to vector<16x32xf32>
    %7 = arith.maximumf %5, %6 : vector<16x32xf32>
    %cst_6 = arith.constant dense<0.000000e+00> : vector<16xf32>
    %8 = vector.multi_reduction <add>, %7, %cst_6 [1] : vector<16x32xf32> to vector<16xf32>
    %9 = vector.shape_cast %8 : vector<16xf32> to vector<16x1xf32>
    %cst_7 = arith.constant 3.200000e+01 : f32
    %10 = vector.broadcast %cst_7 : f32 to vector<16x1xf32>
    %11 = arith.divf %9, %10 : vector<16x1xf32>
    %12 = vector.broadcast %11 : vector<16x1xf32> to vector<16x32xf32>
    %13 = arith.subf %7, %12 : vector<16x32xf32>
    %14 = arith.mulf %13, %13 : vector<16x32xf32>
    %cst_8 = arith.constant dense<0.000000e+00> : vector<16xf32>
    %15 = vector.multi_reduction <add>, %14, %cst_8 [1] : vector<16x32xf32> to vector<16xf32>
    %16 = vector.shape_cast %15 : vector<16xf32> to vector<16x1xf32>
    %cst_9 = arith.constant 3.200000e+01 : f32
    %17 = vector.broadcast %cst_9 : f32 to vector<16x1xf32>
    %18 = arith.divf %16, %17 : vector<16x1xf32>
    %cst_10 = arith.constant 9.99999996E-13 : f32
    %19 = vector.broadcast %cst_10 : f32 to vector<16x1xf32>
    %20 = arith.addf %18, %19 : vector<16x1xf32>
    %21 = math.rsqrt %20 : vector<16x1xf32>
    %22 = vector.broadcast %21 : vector<16x1xf32> to vector<16x32xf32>
    %23 = arith.mulf %13, %22 : vector<16x32xf32>
    %c0_11 = arith.constant 0 : index
    %c0_12 = arith.constant 0 : index
    %24 = vector.load %arg4[%c0_11, %c0_12] : memref<1x32xf32, #tpu.memory_space<vmem>>, vector<1x32xf32>
    %25 = vector.broadcast %24 : vector<1x32xf32> to vector<16x32xf32>
    %26 = arith.mulf %23, %25 : vector<16x32xf32>
    %c0_13 = arith.constant 0 : index
    %c0_14 = arith.constant 0 : index
    %27 = vector.load %arg5[%c0_13, %c0_14] : memref<1x32xf32, #tpu.memory_space<vmem>>, vector<1x32xf32>
    %28 = vector.broadcast %27 : vector<1x32xf32> to vector<16x32xf32>
    %29 = arith.addf %26, %28 : vector<16x32xf32>
    %30 = arith.truncf %29 : vector<16x32xf32> to vector<16x32xbf16>
    %c0_15 = arith.constant 0 : index
    %c0_16 = arith.constant 0 : index
    %31 = vector.load %arg6[%c0_15, %c0_16] : memref<16x32xbf16, #tpu.memory_space<vmem>>, vector<16x32xbf16>
    tpu.vector_store %arg6[%c0_15, %c0_16], %30 {strides = array<i32>} : memref<16x32xbf16, #tpu.memory_space<vmem>>, vector<16x32xbf16>,
    return
  }
  func.func @transform_0(%arg0: i32) -> (i32, i32) {
    %c0_i32 = arith.constant 0 : i32
    %c0_i32_0 = arith.constant 0 : i32
    return %arg0, %c0_i32 : i32, i32
  }
  func.func @transform_1(%arg0: i32) -> (i32, i32) {
    %c0_i32 = arith.constant 0 : i32
    %c0_i32_0 = arith.constant 0 : i32
    %c0_i32_1 = arith.constant 0 : i32
    return %c0_i32, %c0_i32_0 : i32, i32
  }
  func.func @transform_2(%arg0: i32) -> (i32, i32) {
    %c0_i32 = arith.constant 0 : i32
    %c0_i32_0 = arith.constant 0 : i32
    %c0_i32_1 = arith.constant 0 : i32
    return %c0_i32, %c0_i32_0 : i32, i32
  }
  func.func @transform_3(%arg0: i32) -> (i32, i32) {
    %c0_i32 = arith.constant 0 : i32
    %c0_i32_0 = arith.constant 0 : i32
    %c0_i32_1 = arith.constant 0 : i32
    return %c0_i32, %c0_i32_0 : i32, i32
  }
  func.func @transform_4(%arg0: i32) -> (i32, i32) {
    %c0_i32 = arith.constant 0 : i32
    %c0_i32_0 = arith.constant 0 : i32
    %c0_i32_1 = arith.constant 0 : i32
    return %c0_i32, %c0_i32_0 : i32, i32
  }
  func.func @transform_5(%arg0: i32) -> (i32, i32) {
    %c0_i32 = arith.constant 0 : i32
    %c0_i32_0 = arith.constant 0 : i32
    return %arg0, %c0_i32 : i32, i32
  }
}

</mosaic_0001>

<bundles_post_ra>
// kernel: tpu_custom_call.1
= control target key start
LH: loop header
LB: loop body
LE: loop exit
PB: predicated region body
PF: predicated region fallthrough
CT: control target
= control target key end

     0   :  { %10 = vsyncpa [#allocation3], 0  ;;  %s372_s0 = inlined_call_operand.hbm [shape: bf16[16,32], index: 0, kind: input, shape index: {}]   ;;  %s373_s1 = inlined_call_operand.hbm [shape: bf16[32,32], index: 1, kind: input, shape index: {}]   ;;  %s374_s2 = inlined_call_operand.vmem [shape: f32[1,32], index: 2, kind: input, shape index: {}]   ;;  %s375_s3 = inlined_call_operand.vmem [shape: f32[1,32], index: 3, kind: input, shape index: {}]   ;;  %s376_s4 = inlined_call_operand.vmem [shape: f32[1,32], index: 4, kind: input, shape index: {}]   ;;  %s377_s5 = inlined_call_operand.hbm [shape: bf16[16,32], index: 5, kind: output, shape index: {}]  }
   0x1   :  { %11 = vsyncpa [#allocation6], 0 }
   0x2   :  { %12 = vsyncpa [#allocation4], 0  ;;  %s303_s18 = smov [#allocation2]  }
   0x3   :  { %s18_s19 = sshll.u32 %s303_s18, 4  ;;  %s19_s19 = int_to_ptr.vmem [resolvable:$true] %s18_s19 }
   0x4   :  { %s245_s20 = scalar_lea.vmem %s19_s19, 128  ;;  %p250_p1 = scmp.lt.s32.totalorder %s19_s19, %s19_s19 }
   0x5   :  { %p246_p0 = scmp.ne.s32.totalorder %s19_s19, %s245_s20  ;;  %p251_p2 = scmp.lt.s32.totalorder %s245_s20, %s245_s20 }
   0x7   :  { %p252_p3 = por %p251_p2, %p250_p1 }
   0x9   :  { %p253_p4 = pnand %p252_p3, %p246_p0 }
   0xb   :  { %256 = shalt.err (!%p253_p4)
}
   0xc   :  { %s304_s21 = smov 64   ;;  %s305_s22 = smov 4  }
   0xd   :  { %24 = dma.hbm_to_vmem [thread:$0]  %s372_s0, 128, %s19_s19, [#allocation3], %s304_s21, %s304_s21, %s305_s22  }
   0xe   :  { %s306_s25 = smov [#allocation5]  }
   0xf   :  { %s30_s26 = sshll.u32 %s306_s25, 4  ;;  %s31_s26 = int_to_ptr.vmem [resolvable:$true] %s30_s26 }
  0x10   :  { %s265_s27 = scalar_lea.vmem %s31_s26, 256  ;;  %p270_p6 = scmp.lt.s32.totalorder %s31_s26, %s31_s26 }
  0x11   :  { %p266_p5 = scmp.ne.s32.totalorder %s31_s26, %s265_s27  ;;  %p271_p7 = scmp.lt.s32.totalorder %s265_s27, %s265_s27 }
  0x13   :  { %p272_p8 = por %p271_p7, %p270_p6 }
  0x15   :  { %p273_p9 = pnand %p272_p8, %p266_p5 }
  0x17   :  { %276 = shalt.err (!%p273_p9)
}
  0x18   :  { %36 = dma.hbm_to_vmem [thread:$0]  %s373_s1, 256, %s31_s26, [#allocation6], %s304_s21, %s304_s21, %s305_s22  }
  0x19   :  { %297 = dma.done.wait [#allocation3], 128  }
  0x1a   :  { %298 = vsyncadd [#allocation3], 4294967168 }
  0x1b   :  { %299 = dma.done.wait [#allocation6], 256  }
  0x1c   :  { %300 = vsyncadd [#allocation6], 4294967040  ;;  %v307_v0 = vmov 0.0   ;;  %vm308_vm0 = vmmov 0   ;;  %v230_v1 = vld [vmem:[#allocation5 + $0x8] sm:$0xff]   ;;  %v231_v2 = vld [vmem:[#allocation5] sm:$0xff]  }
  0x1d   :  { %215 = vmatprep.subr.bf16.mxu0 %v307_v0  ;;  %219 = vmatprep.mubr.msk.bf16.mxu0 %vm308_vm0, %v307_v0  ;;  %v232_v3 = vld [vmem:[#allocation2] sm:$0xff]   ;;  %vm80_vm1 = vcmask 261120   ;;  %vm180_vm2 = vcmask 257024   ;;  %s309_s8 = smov [#allocation7]  }
  0x1e   :  { %216 = vmatpush3.bf16.msra.mxu0 %v230_v1  ;;  %v201_v4 = vld [vmem:[%s374_s2] ss:$0 sm:$0xff]  ;;  %s188_s9 = sshll.u32 %s309_s8, 4  ;;  %s189_s9 = int_to_ptr.vmem [resolvable:$true] %s188_s9 }
  0x1f   :  { %217 = vmatprep.subr.bf16.mxu0 %v307_v0  ;;  %v206_v32 = vld [vmem:[%s375_s3] ss:$0 sm:$0xff]  ;;  %s277_s3 = scalar_lea.vmem %s189_s9, 128  ;;  %p282_p11 = scmp.lt.s32.totalorder %s189_s9, %s189_s9 }
  0x20   :  { %v207_v34 = vld [vmem:[%s376_s4] ss:$0 sm:$0xff]  ;;  %p278_p10 = scmp.ne.s32.totalorder %s189_s9, %s277_s3  ;;  %p283_p12 = scmp.lt.s32.totalorder %s277_s3, %s277_s3 }
  0x22   :  { %218 = vmatpush3.bf16.msra.mxu0 %v231_v2  ;;  %p284_p13 = por %p283_p12, %p282_p11 }
  0x24   :  { %p285_p0 = pnand %p284_p13, %p278_p10 }
  0x25   :  { %220 = vmatmul.mubr.msk.bf16.vlgmr.msra.gmra.mxu0 %vm80_vm1, %v232_v3 }
  0xe5   :  { %v118_v5 = vpop.f32.mrf.mxu0 }
  0xe6   :  { %v119_v6 = vadd.f32 %v201_v4, %v118_v5 }
  0xe7   :  { %v221_v7 = vpop.f32.mrf.mxu0 }
  0xe8   :  { %v125_v8 = vmax.f32 %v119_v6, 0.0 }
  0xe9   :  { %v121_v9 = vpop.f32.mrf.mxu0 }
  0xea   :  { %v122_v10 = vadd.f32 %v201_v4, %v121_v9  ;;  %v127_v11 = vsel %vm80_vm1, %v125_v8, 0.0 }
  0xeb   :  { %128 = vadd.xlane.f32.xlu0 %v127_v11  ;;  %v222_v12 = vpop.f32.mrf.mxu0 }
  0xec   :  { %v126_v13 = vmax.f32 %v122_v10, 0.0 }
  0xee   :  { %v130_v14 = vsel %vm80_vm1, %v126_v13, 0.0 }
  0xef   :  { %131 = vadd.xlane.f32.xlu0 %v130_v14 }
 0x174   :  { %v129_v15 = vpop.xlane.xlu0 %128 }
 0x175   :  { %v134_v16 = vmul.f32 0.03125, %v129_v15 }
 0x177   :  { %v136_v17 = vsub.f32 %v125_v8, %v134_v16 }
 0x178   :  { %v132_v18 = vpop.xlane.xlu0 %131 }
 0x179   :  { %v135_v19 = vmul.f32 0.03125, %v132_v18  ;;  %v138_v20 = vmul.f32 %v136_v17, %v136_v17 }
 0x17b   :  { %v137_v21 = vsub.f32 %v126_v13, %v135_v19  ;;  %v140_v22 = vsel %vm80_vm1, %v138_v20, 0.0 }
 0x17c   :  { %141 = vadd.xlane.f32.xlu1 %v140_v22 }
 0x17d   :  { %v139_v23 = vmul.f32 %v137_v21, %v137_v21 }
 0x17f   :  { %v143_v24 = vsel %vm80_vm1, %v139_v23, 0.0 }
 0x180   :  { %144 = vadd.xlane.f32.xlu1 %v143_v24 }
 0x205   :  { %v142_v25 = vpop.xlane.xlu1 %141 }
 0x206   :  { %v146_v26 = vmul.f32 0.03125, %v142_v25 }
 0x208   :  { %v148_v27 = vadd.f32 1e-12, %v146_v26 }
 0x209   :  { %v145_v28 = vpop.xlane.xlu1 %144 }
 0x20a   :  { %233 = vrsqrt.f32 %v148_v27  ;;  %v147_v29 = vmul.f32 0.03125, %v145_v28 }
 0x20c   :  { %v149_v30 = vadd.f32 1e-12, %v147_v29 }
 0x20e   :  { %235 = vrsqrt.f32 %v149_v30 }
 0x217   :  { %v234_v31 = vpop.eup %233 }
 0x218   :  { %v152_v33 = vmul.f32 %v234_v31, %v136_v17 }
 0x21a   :  { %v161_v35 = vmul.f32 %v206_v32, %v152_v33 }
 0x21b   :  { %v236_v36 = vpop.eup %235 }
 0x21c   :  { %v153_v37 = vmul.f32 %v236_v36, %v137_v21  ;;  %v170_v38 = vadd.f32 %v207_v34, %v161_v35 }
 0x21e   :  { %v162_v39 = vmul.f32 %v206_v32, %v153_v37  ;;  %v210_v40 = vpack.c.bf16 %v170_v38, %v170_v38 }
 0x220   :  { %v171_v41 = vadd.f32 %v207_v34, %v162_v39  ;;  %181 = vst.msk [vmem:[#allocation7] sm:$0xf] %vm180_vm2, %v210_v40 }
 0x222   :  { %v211_v42 = vpack.c.bf16 %v171_v41, %v171_v41 }
 0x224   :  { %182 = vst.msk [vmem:[#allocation7 + $0x4] sm:$0xf] %vm180_vm2, %v211_v42 }
 0x225   :  { %288 = shalt.err (!%p285_p0)
}
 0x226   :  { %194 = dma.vmem_to_hbm [thread:$0]  %s189_s9, 128, %s377_s5, [#allocation4], %s304_s21, %s304_s21, %s305_s22  }
 0x227   :  { %301 = dma.done.wait [#allocation4], 128  }
 0x228   :  { %302 = vsyncadd [#allocation4], 4294967168 }
 0x229   :  { %198 = vsyncpa [#allocation3], 1 }
 0x22a   :  { %199 = vsyncpa [#allocation6], 1 }
 0x22b   :  { %200 = vsyncpa [#allocation4], 1 }

</bundles_post_ra>
